<compile_context>
chip_gen: v7x
topology: tpu7x:2x2x1
jax: 0.10.0
libtpu: 0.0.40
codegen_flags: <defaults>
</compile_context>

<pallas_src>
import jax
import jax.numpy as jnp
from jax.experimental import pallas as pl
from jax.experimental.pallas import tpu as pltpu


# Below this many elements (1 MiB of f32) the Pallas custom-call dispatch dominates;
# let XLA fuse the elementwise op instead.
_PALLAS_MIN_ELEMS = 1 << 18

_LANE_WIDTH = 1024       # preferred lane-dense last dim (multiple of 128)
_TILE_BYTES = 2 << 20    # ~2 MiB per tile -> 4 x tile resident (in+out, double-buffered)


def _relu_kernel(x_ref, o_ref):
    # The "fn" wrapped by _WrapperModule: elementwise ReLU (single VPU vmax per vreg).
    o_ref[...] = jnp.maximum(x_ref[...], 0)


def _round_up(n, m):
    return ((n + m - 1) // m) * m


def _sublane_packing(dtype):
    # Rows per sublane group: 8 for 4-byte, 16 for 2-byte, 32 for 1-byte dtypes.
    itemsize = jnp.dtype(dtype).itemsize
    return max(8, 32 // max(itemsize, 1))


def _pick_lane_width(total):
    # Largest lane-dense width that divides the element count -> free reshape, no pad.
    for w in (_LANE_WIDTH, 512, 256, 128):
        if total % w == 0:
            return w
    return None


def _pallas_relu(x):
    """Tiled Pallas ReLU for arbitrary-shaped inputs (flatten -> lane-dense 2D slab)."""
    orig_shape = x.shape
    total = int(x.size)
    dtype = x.dtype
    itemsize = jnp.dtype(dtype).itemsize
    sub = _sublane_packing(dtype)

    w = _pick_lane_width(total)
    if w is not None:
        # Fast path: free reshape, no pad before / no slice after the kernel.
        rows = total // w
        x2d = x.reshape(rows, w)
        needs_slice = False
    else:
        # Fallback for sizes not divisible by 128: one pad + one slice-back.
        w = _LANE_WIDTH
        rows = pl.cdiv(total, w)
        flat = jnp.pad(x.reshape(-1), (0, rows * w - total))
        x2d = flat.reshape(rows, w)
        needs_slice = True

    # Tile rows: ~_TILE_BYTES per tile, aligned to the dtype's sublane packing.
    # When the whole slab is smaller than one tile, use a single full-extent block
    # (block dim equal to the full array dim is always legal, no (8,128) constraint).
    tr_target = max(sub, (_TILE_BYTES // (w * itemsize)) // sub * sub)
    tr = rows if rows <= tr_target else tr_target
    grid = (pl.cdiv(rows, tr),)   # ragged last block is masked by Pallas

    y2d = pl.pallas_call(
        _relu_kernel,
        out_shape=jax.ShapeDtypeStruct((rows, w), dtype),
        grid=grid,
        in_specs=[pl.BlockSpec((tr, w), lambda i: (i, 0))],
        out_specs=pl.BlockSpec((tr, w), lambda i: (i, 0)),
        compiler_params=pltpu.CompilerParams(
            dimension_semantics=("parallel",),
        ),
        cost_estimate=pl.CostEstimate(
            flops=rows * w,
            transcendentals=0,
            bytes_accessed=2 * rows * w * itemsize,
        ),
    )(x2d)

    if needs_slice:
        return y2d.reshape(-1)[:total].reshape(orig_shape)
    return y2d.reshape(orig_shape)


def wrapper_module_forward(*args, _force_pallas=False, **kwargs):
    """Equivalent of _WrapperModule.forward: just calls the wrapped fn.

    The wrapped fn here is elementwise ReLU; small inputs use the fused XLA op,
    large inputs (or _force_pallas=True) use the tiled Pallas kernel.
    """
    (x,) = args  # the wrapped fn here takes a single tensor argument
    assert not kwargs
    if not _force_pallas and x.size < _PALLAS_MIN_ELEMS:
        # Fused XLA elementwise path: strictly at least as fast as a standalone kernel
        # at this size (avoids custom-call dispatch + forfeited producer/consumer fusion).
        return jnp.maximum(x, 0)
    return _pallas_relu(x)


if __name__ == "__main__":
    key = jax.random.PRNGKey(0)
    k1, k2, k3 = jax.random.split(key, 3)

    # Small NCHW input consistent with a typical wrapped functional call.
    x = jax.random.normal(k1, (2, 4, 16, 16), dtype=jnp.float32)        # 2048 elems
    # Odd-size input: exercises the pad fallback (105 elems, not 128-divisible).
    x_odd = jax.random.normal(k2, (3, 5, 7), dtype=jnp.float32)
    # 128-divisible but not 1024-divisible: exercises the narrower no-pad lane width.
    x_128 = jax.random.normal(k3, (1, 9, 640), dtype=jnp.float32)       # 5760 elems

    # Default wrapper path (routes these tiny inputs to the fused XLA op).
    y_small = wrapper_module_forward(x)
    # Explicitly exercise the Pallas tiled-kernel paths.
    y_pallas = wrapper_module_forward(x, _force_pallas=True)
    y_odd = wrapper_module_forward(x_odd, _force_pallas=True)
    y_128 = wrapper_module_forward(x_128, _force_pallas=True)
    jax.block_until_ready((y_small, y_pallas, y_odd, y_128))

    # Correctness checks against the pure-JAX reference of the wrapped fn.
    for out, inp in ((y_small, x), (y_pallas, x), (y_odd, x_odd), (y_128, x_128)):
        ref = jnp.maximum(inp, 0.0)
        assert out.shape == inp.shape and out.dtype == inp.dtype
        assert bool(jnp.array_equal(out, ref)), "mismatch vs reference"

    print("KERNEL_OK")
</pallas_src>

<mosaic_0001>
module attributes {stable_mosaic.version = 11 : i64} {
  func.func @_relu_kernel(%arg0: i32, %arg1: memref<2x1024xf32, #tpu.memory_space<vmem>>, %arg2: memref<2x1024xf32, #tpu.memory_space<vmem>>) attributes {dimension_semantics = [#tpu.dimension_semantics<parallel>], iteration_bounds = array<i64: 1>, scalar_prefetch = 0 : i64, scratch_operands = 0 : i64, tpu.core_type = #tpu.core_type<tc>, window_params = [{transform_indices = @transform_0, window_bounds = array<i64: 2, 1024>}, {transform_indices = @transform_1, window_bounds = array<i64: 2, 1024>}]} {
    %c0 = arith.constant 0 : index
    %c0_0 = arith.constant 0 : index
    %0 = vector.load %arg1[%c0, %c0_0] : memref<2x1024xf32, #tpu.memory_space<vmem>>, vector<2x1024xf32>
    %cst = arith.constant 0.000000e+00 : f32
    %1 = vector.broadcast %cst : f32 to vector<2x1024xf32>
    %2 = arith.maximumf %0, %1 : vector<2x1024xf32>
    %c0_1 = arith.constant 0 : index
    %c0_2 = arith.constant 0 : index
    %3 = vector.load %arg2[%c0_1, %c0_2] : memref<2x1024xf32, #tpu.memory_space<vmem>>, vector<2x1024xf32>
    tpu.vector_store %arg2[%c0_1, %c0_2], %2 {strides = array<i32>} : memref<2x1024xf32, #tpu.memory_space<vmem>>, vector<2x1024xf32>,
    return
  }
  func.func @transform_0(%arg0: i32) -> (i32, i32) {
    %c0_i32 = arith.constant 0 : i32
    %c0_i32_0 = arith.constant 0 : i32
    return %arg0, %c0_i32 : i32, i32
  }
  func.func @transform_1(%arg0: i32) -> (i32, i32) {
    %c0_i32 = arith.constant 0 : i32
    %c0_i32_0 = arith.constant 0 : i32
    return %arg0, %c0_i32 : i32, i32
  }
}

</mosaic_0001>

<bundles_post_ra>
// kernel: tpu_custom_call.1
= control target key start
LH: loop header
LB: loop body
LE: loop exit
PB: predicated region body
PF: predicated region fallthrough
CT: control target
= control target key end

     0   :  { %6 = vsyncpa [#allocation3], 0  ;;  %s128_s0 = inlined_call_operand.hbm [shape: f32[2,1024], index: 0, kind: input, shape index: {}]   ;;  %s129_s1 = inlined_call_operand.hbm [shape: f32[2,1024], index: 1, kind: output, shape index: {}]  }
   0x1   :  { %7 = vsyncpa [#allocation4], 0  ;;  %s92_s6 = smov [#allocation2]   ;;  %s44_s10 = scalar_lea.hbm %s128_s0, 256 }
   0x2   :  { %s14_s7 = sshll.u32 %s92_s6, 4  ;;  %p45_p0 = scmp.ne.s32.totalorder %s128_s0, %s44_s10  ;;  %s15_s7 = int_to_ptr.vmem [resolvable:$true] %s14_s7 }
   0x3   :  { %p48_p1 = scmp.lt.u32.totalorder %s44_s10, %s128_s0 }
   0x5   :  { %p50_p2 = pnand %p48_p1, %p45_p0 }
   0x7   :  { %53 = shalt.err (!%p50_p2)
}
   0x8   :  { %s54_s15 = scalar_lea.vmem %s15_s7, 256  ;;  %p59_p4 = scmp.lt.s32.totalorder %s15_s7, %s15_s7 }
   0x9   :  { %p55_p3 = scmp.ne.s32.totalorder %s15_s7, %s54_s15  ;;  %p60_p5 = scmp.lt.s32.totalorder %s54_s15, %s54_s15 }
   0xb   :  { %p61_p6 = por %p60_p5, %p59_p4 }
   0xd   :  { %p62_p7 = pnand %p61_p6, %p55_p3 }
   0xf   :  { %65 = shalt.err (!%p62_p7)
}
  0x10   :  { %17 = dma.hbm_to_vmem [thread:$0]  %s128_s0, 256, %s15_s7, [#allocation3]  }
  0x11   :  { %88 = dma.done.wait [#allocation3], 256  }
  0x12   :  { %89 = vsyncadd [#allocation3], 4294967040  ;;  %s93_s18 = smov [#allocation5]   ;;  %v21_v0 = vld [vmem:[#allocation2] sm:$0xff]  ;;  %v22_v1 = vld [vmem:[#allocation2 + $0x8] sm:$0xff] }
  0x13   :  { %s33_s19 = sshll.u32 %s93_s18, 4  ;;  %v23_v2 = vmax.f32 %v21_v0, 0.0  ;;  %v24_v3 = vmax.f32 %v22_v1, 0.0  ;;  %s34_s19 = int_to_ptr.vmem [resolvable:$true] %s33_s19 }
  0x14   :  { %s66_s20 = scalar_lea.vmem %s34_s19, 256  ;;  %p71_p9 = scmp.lt.s32.totalorder %s34_s19, %s34_s19 }
  0x15   :  { %25 = vst [vmem:[#allocation5] sm:$0xff] %v23_v2  ;;  %26 = vst [vmem:[#allocation5 + $0x8] sm:$0xff] %v24_v3  ;;  %p67_p8 = scmp.ne.s32.totalorder %s34_s19, %s66_s20  ;;  %p72_p10 = scmp.lt.s32.totalorder %s66_s20, %s66_s20 }
  0x17   :  { %p73_p11 = por %p72_p10, %p71_p9 }
  0x19   :  { %p74_p12 = pnand %p73_p11, %p67_p8 }
  0x1b   :  { %77 = shalt.err (!%p74_p12)
}
  0x1c   :  { %s78_s22 = scalar_lea.hbm %s129_s1, 256 }
  0x1d   :  { %p79_p13 = scmp.ne.s32.totalorder %s129_s1, %s78_s22  ;;  %p82_p0 = scmp.lt.u32.totalorder %s78_s22, %s129_s1 }
  0x1f   :  { %p84_p1 = pnand %p82_p0, %p79_p13 }
  0x21   :  { %87 = shalt.err (!%p84_p1)
}
  0x22   :  { %36 = dma.vmem_to_hbm [thread:$0]  %s34_s19, 256, %s129_s1, [#allocation4]  }
  0x23   :  { %90 = dma.done.wait [#allocation4], 256  }
  0x24   :  { %91 = vsyncadd [#allocation4], 4294967040 }
  0x25   :  { %40 = vsyncpa [#allocation3], 1 }
  0x26   :  { %41 = vsyncpa [#allocation4], 1 }

</bundles_post_ra>
